<compile_context>
chip_gen: v5e
topology: v5e:2x2
jax: 0.10.0
libtpu: 0.0.40
codegen_flags: <defaults>
</compile_context>

<pallas_src>
import math

import jax
import jax.numpy as jnp
from jax.experimental import pallas as pl
from jax.experimental.pallas import tpu as pltpu

_EPS = 1e-12  # F.normalize default eps


def _round_up(x: int, m: int) -> int:
    return ((x + m - 1) // m) * m


# ----------------------------------------------------------------------------
# Kernels
# ----------------------------------------------------------------------------
def _mm_accumulate_out_kernel(f_ref, wt_ref, o_ref):
    """f32 output: the output block is resident across the K axis (its
    index_map ignores k), so accumulate directly into it -- no scratch."""
    @pl.when(pl.program_id(2) == 0)
    def _init():
        o_ref[...] = jnp.zeros_like(o_ref)

    o_ref[...] += jnp.dot(
        f_ref[...], wt_ref[...], preferred_element_type=jnp.float32
    )


def _mm_scratch_kernel(f_ref, wt_ref, o_ref, acc_ref):
    """Non-f32 output: keep an f32 VMEM accumulator, cast once at the end
    (halves the output HBM write for bf16 outputs)."""
    k = pl.program_id(2)

    @pl.when(k == 0)
    def _init():
        acc_ref[...] = jnp.zeros_like(acc_ref)

    acc_ref[...] += jnp.dot(
        f_ref[...], wt_ref[...], preferred_element_type=jnp.float32
    )

    @pl.when(k == pl.num_programs(2) - 1)
    def _finalize():
        o_ref[...] = acc_ref[...].astype(o_ref.dtype)


# ----------------------------------------------------------------------------
# Weight preprocessing (cache this across forward calls!)
# ----------------------------------------------------------------------------
def prepare_arc_margin_weight(weight: jax.Array, *, tn_max: int = 1024,
                              tk_max: int = 512):
    """Single fused pass over the (C, D) weight: fold 1/||w_row|| in, cast to
    bf16, transpose to (D, C), pad to tile multiples.  The result only changes
    on optimizer steps, so callers should cache it between forward calls.
    Returns (wt_padded_bf16, meta)."""
    C, D = weight.shape
    tn = min(tn_max, _round_up(C, 256))   # lane-dense, multiple of 256 (and 128)
    tk = min(tk_max, _round_up(D, 128))
    Cp = _round_up(C, tn)
    Dp = _round_up(D, tk)

    w = weight.astype(jnp.float32)
    # x / max(||x||, eps)  ==  x * rsqrt(max(sumsq, eps^2))
    w_inv = jax.lax.rsqrt(
        jnp.maximum(jnp.sum(w * w, axis=1, keepdims=True), _EPS * _EPS))
    wt = (w * w_inv).astype(jnp.bfloat16).T          # (D, C), norm-folded
    if (Dp, Cp) != (D, C):                           # skip pad when aligned
        wt = jnp.pad(wt, ((0, Dp - D), (0, Cp - C)))
    return wt, (C, D, Cp, Dp, tn, tk)


# ----------------------------------------------------------------------------
# Forward
# ----------------------------------------------------------------------------
def arc_margin_product_prepared(features: jax.Array, prepared, *,
                                tm_max: int = 512,
                                out_dtype=jnp.float32,
                                weight_pipeline_buffers: int | None = None
                                ) -> jax.Array:
    """cosine logits (B, out_features) from pre-processed weight."""
    wt_bf, (C, D, Cp, Dp, tn, tk) = prepared
    B, D2 = features.shape
    assert D2 == D, "in_features mismatch"

    # Features: fold 1/||f_row|| in before the bf16 cast; pad only if needed.
    f = features.astype(jnp.float32)
    f_inv = jax.lax.rsqrt(
        jnp.maximum(jnp.sum(f * f, axis=1, keepdims=True), _EPS * _EPS))
    f_bf = (f * f_inv).astype(jnp.bfloat16)
    tm = min(tm_max, _round_up(B, 16))   # 16: bf16 packs 16 sublanes per vreg
    Bp = _round_up(B, tm)
    if (Bp, Dp) != (B, D):
        f_bf = jnp.pad(f_bf, ((0, Bp - B), (0, Dp - D)))

    grid = (Bp // tm, Cp // tn, Dp // tk)

    # Optional deeper buffering on the weight stream (v7x: Buffered(3) hides
    # HBM contention between the two TensorCores).
    w_spec_kwargs = {}
    if weight_pipeline_buffers is not None and weight_pipeline_buffers != 2:
        w_spec_kwargs = dict(pipeline_mode=pl.Buffered(weight_pipeline_buffers))

    out_dtype = jnp.dtype(out_dtype)
    if out_dtype == jnp.float32:
        kernel = _mm_accumulate_out_kernel
        scratch = []
    else:
        kernel = _mm_scratch_kernel
        scratch = [pltpu.VMEM((tm, tn), jnp.float32)]

    cost = pl.CostEstimate(
        flops=2 * Bp * Cp * Dp,
        transcendentals=0,
        bytes_accessed=2 * (Bp * Dp + Dp * Cp) + out_dtype.itemsize * Bp * Cp,
    )

    out_padded = pl.pallas_call(
        kernel,
        out_shape=jax.ShapeDtypeStruct((Bp, Cp), out_dtype),
        grid_spec=pltpu.PrefetchScalarGridSpec(
            num_scalar_prefetch=0,
            grid=grid,
            in_specs=[
                # features tile: depends on (i, k) only
                pl.BlockSpec((tm, tk), lambda i, j, k: (i, k)),
                # normalized weight^T tile: independent of the B axis (i)
                pl.BlockSpec((tk, tn), lambda i, j, k: (k, j), **w_spec_kwargs),
            ],
            out_specs=pl.BlockSpec((tm, tn), lambda i, j, k: (i, j)),
            scratch_shapes=scratch,
        ),
        compiler_params=pltpu.CompilerParams(
            dimension_semantics=("parallel", "parallel", "arbitrary"),
            # Footprint with max tiles is < ~8 MiB double-buffered; 32 MiB is
            # safely below physical VMEM on v5e/v6e (128 MiB) and v7x (64 MiB)
            # and above the ~16 MiB default scoped limit on v5e.
            vmem_limit_bytes=32 * 1024 * 1024,
        ),
        cost_estimate=cost,
    )(f_bf, wt_bf)

    return out_padded[:B, :C]


def arc_margin_product(features: jax.Array, weight: jax.Array, *,
                       tm_max: int = 512, tn_max: int = 1024,
                       tk_max: int = 512, out_dtype=jnp.float32,
                       weight_pipeline_buffers: int | None = None) -> jax.Array:
    """Convenience wrapper taking the raw (out_features, in_features) weight.
    For repeated forward calls with the same weight, call
    prepare_arc_margin_weight() once and use arc_margin_product_prepared()."""
    prepared = prepare_arc_margin_weight(weight, tn_max=tn_max, tk_max=tk_max)
    return arc_margin_product_prepared(
        features, prepared, tm_max=tm_max, out_dtype=out_dtype,
        weight_pipeline_buffers=weight_pipeline_buffers)


def init_arc_margin_weight(key, in_features: int, out_features: int) -> jax.Array:
    """Deterministic re-implementation of reset_parameters(): U(-stdv, stdv)."""
    stdv = 1.0 / math.sqrt(in_features)
    return jax.random.uniform(
        key, (out_features, in_features), dtype=jnp.float32,
        minval=-stdv, maxval=stdv,
    )


def _reference(features: jax.Array, weight: jax.Array) -> jax.Array:
    f_hat = features / jnp.maximum(
        jnp.linalg.norm(features, axis=1, keepdims=True), _EPS)
    w_hat = weight / jnp.maximum(
        jnp.linalg.norm(weight, axis=1, keepdims=True), _EPS)
    return f_hat @ w_hat.T


if __name__ == "__main__":
    key = jax.random.PRNGKey(0)
    k1, k2, k3, k4 = jax.random.split(key, 4)

    # Case 1: tiny shapes (single-tile grid, padded up to tile multiples).
    B1, D1, C1 = 8, 32, 16
    feats1 = jax.random.normal(k1, (B1, D1), dtype=jnp.float32)
    w1 = init_arc_margin_weight(k2, D1, C1)
    out1 = arc_margin_product(feats1, w1)
    jax.block_until_ready(out1)
    assert out1.shape == (B1, C1) and out1.dtype == jnp.float32
    # bf16 operands (norm-folded) -> loose tolerance vs f32 reference.
    assert jnp.allclose(out1, _reference(feats1, w1), atol=2e-2), "tiny mismatch"

    # Case 2: multi-tile grid (K accumulation, 2 C-tiles, padded B/C/D),
    # with the weight preprocessed once and reused (the cached-weight path).
    B2, D2, C2 = 96, 640, 1200
    feats2 = jax.random.normal(k3, (B2, D2), dtype=jnp.float32)
    w2 = init_arc_margin_weight(k4, D2, C2)
    prepared2 = prepare_arc_margin_weight(w2)
    out2 = arc_margin_product_prepared(feats2, prepared2)
    jax.block_until_ready(out2)
    assert out2.shape == (B2, C2)
    ref2 = _reference(feats2, w2)
    assert float(jnp.max(jnp.abs(out2 - ref2))) < 2e-2, "multi-tile mismatch"

    # Case 3: bf16 output path (scratch-accumulator kernel, halved HBM write).
    out2_bf = arc_margin_product_prepared(feats2, prepared2,
                                          out_dtype=jnp.bfloat16)
    jax.block_until_ready(out2_bf)
    assert out2_bf.dtype == jnp.bfloat16
    assert float(jnp.max(jnp.abs(out2_bf.astype(jnp.float32) - ref2))) < 3e-2, \
        "bf16-output mismatch"

    print("KERNEL_OK")
</pallas_src>

<mosaic_0001>
module attributes {stable_mosaic.version = 11 : i64} {
  func.func @_mm_accumulate_out_kernel(%arg0: i32, %arg1: i32, %arg2: i32, %arg3: memref<16x128xbf16, #tpu.memory_space<vmem>>, %arg4: memref<128x256xbf16, #tpu.memory_space<vmem>>, %arg5: memref<16x256xf32, #tpu.memory_space<vmem>>) attributes {dimension_semantics = [#tpu.dimension_semantics<parallel>, #tpu.dimension_semantics<parallel>, #tpu.dimension_semantics<arbitrary>], iteration_bounds = array<i64: 1, 1, 1>, scalar_prefetch = 0 : i64, scratch_operands = 0 : i64, tpu.core_type = #tpu.core_type<tc>, window_params = [{transform_indices = @transform_0, window_bounds = array<i64: 16, 128>}, {transform_indices = @transform_1, window_bounds = array<i64: 128, 256>}, {transform_indices = @transform_2, window_bounds = array<i64: 16, 256>}]} {
    %c0_i32 = arith.constant 0 : i32
    %0 = arith.cmpi eq, %arg2, %c0_i32 : i32
    %1 = arith.extui %0 : i1 to i32
    %c0_i32_0 = arith.constant 0 : i32
    %2 = arith.cmpi ne, %1, %c0_i32_0 : i32
    scf.if %2 {
      %cst_8 = arith.constant 0.000000e+00 : f32
      %9 = vector.broadcast %cst_8 : f32 to vector<16x256xf32>
      %c0_9 = arith.constant 0 : index
      %c0_10 = arith.constant 0 : index
      %10 = vector.load %arg5[%c0_9, %c0_10] : memref<16x256xf32, #tpu.memory_space<vmem>>, vector<16x256xf32>
      tpu.vector_store %arg5[%c0_9, %c0_10], %9 {strides = array<i32>} : memref<16x256xf32, #tpu.memory_space<vmem>>, vector<16x256xf32>,
    } else {
    }
    %c0 = arith.constant 0 : index
    %c0_1 = arith.constant 0 : index
    %3 = vector.load %arg5[%c0, %c0_1] : memref<16x256xf32, #tpu.memory_space<vmem>>, vector<16x256xf32>
    %c0_2 = arith.constant 0 : index
    %c0_3 = arith.constant 0 : index
    %4 = vector.load %arg3[%c0_2, %c0_3] : memref<16x128xbf16, #tpu.memory_space<vmem>>, vector<16x128xbf16>
    %c0_4 = arith.constant 0 : index
    %c0_5 = arith.constant 0 : index
    %5 = vector.load %arg4[%c0_4, %c0_5] : memref<128x256xbf16, #tpu.memory_space<vmem>>, vector<128x256xbf16>
    %cst = arith.constant dense<0.000000e+00> : vector<16x256xf32>
    %6 = tpu.matmul %4, %5, %cst {dimension_numbers = #tpu.dot_dimension_numbers<[1], [0], [0], [1], [0, 0, 1, 1], [], []>} : vector<16x128xbf16>, vector<128x256xbf16>, vector<16x256xf32> -> vector<16x256xf32>
    %7 = arith.addf %3, %6 : vector<16x256xf32>
    %c0_6 = arith.constant 0 : index
    %c0_7 = arith.constant 0 : index
    %8 = vector.load %arg5[%c0_6, %c0_7] : memref<16x256xf32, #tpu.memory_space<vmem>>, vector<16x256xf32>
    tpu.vector_store %arg5[%c0_6, %c0_7], %7 {strides = array<i32>} : memref<16x256xf32, #tpu.memory_space<vmem>>, vector<16x256xf32>,
    return
  }
  func.func @transform_0(%arg0: i32, %arg1: i32, %arg2: i32) -> (i32, i32) {
    %c0_i32 = arith.constant 0 : i32
    return %arg0, %arg2 : i32, i32
  }
  func.func @transform_1(%arg0: i32, %arg1: i32, %arg2: i32) -> (i32, i32) {
    %c0_i32 = arith.constant 0 : i32
    return %arg2, %arg1 : i32, i32
  }
  func.func @transform_2(%arg0: i32, %arg1: i32, %arg2: i32) -> (i32, i32) {
    %c0_i32 = arith.constant 0 : i32
    return %arg0, %arg1 : i32, i32
  }
}

</mosaic_0001>

<bundles_post_ra>
// kernel: tpu_custom_call.1
= control target key start
LH: loop header
LB: loop body
LE: loop exit
PB: predicated region body
PF: predicated region fallthrough
CT: control target
= control target key end

     0   :  { %7 = vsyncpa [#allocation3], 0  ;;  %s422_s0 = inlined_call_operand.hbm [shape: bf16[16,128], index: 0, kind: input, shape index: {}]   ;;  %s423_s1 = inlined_call_operand.hbm [shape: bf16[128,256], index: 1, kind: input, shape index: {}]   ;;  %s424_s2 = inlined_call_operand.hbm [shape: f32[16,256], index: 2, kind: output, shape index: {}]  }
   0x1   :  { %8 = vsyncpa [#allocation6], 0 }
   0x2   :  { %9 = vsyncpa [#allocation4], 0  ;;  %s14_s11 = sshll.u32 %s422_s0, 4  ;;  %s389_s12 = smov [#allocation2]   ;;  %s15_s11 = int_to_ptr.hbm [resolvable:$true] %s14_s11 }
   0x3   :  { %s16_s13 = sshll.u32 %s389_s12, 4  ;;  %s27_s16 = sshll.u32 %s423_s1, 4  ;;  %s17_s13 = int_to_ptr.vmem [resolvable:$true] %s16_s13  ;;  %s28_s16 = int_to_ptr.hbm [resolvable:$true] %s27_s16 }
   0x4   :  { %s390_s17 = smov 64   ;;  %s391_s18 = smov 4  }
   0x5   :  { %22 = dma.hbm_to_vmem [thread:$0]  %s15_s11, 128, %s17_s13, [#allocation3], %s390_s17, %s390_s17, %s391_s18  }
   0x6   :  { %s392_s19 = smov [#allocation5]   ;;  %s393_s21 = smov 128  }
   0x7   :  { %s29_s20 = sshll.u32 %s392_s19, 4  ;;  %s394_s22 = smov 8   ;;  %s30_s20 = int_to_ptr.vmem [resolvable:$true] %s29_s20 }
   0x8   :  { %35 = dma.hbm_to_vmem [thread:$0]  %s28_s16, 2048, %s30_s20, [#allocation6], %s393_s21, %s393_s21, %s394_s22  }
   0x9   :  { %383 = dma.done.wait [#allocation3], 128  }
   0xa   :  { %384 = vsyncadd [#allocation3], 4294967168 }
   0xb   :  { %385 = dma.done.wait [#allocation6], 2048  }
   0xc   :  { %386 = vsyncadd [#allocation6], 4294965248  ;;  %v278_v0 = vld [vmem:[#allocation5 + $0x70] sm:$0xf]  ;;  %v300_v1 = vld [vmem:[#allocation5 + $0x74] sm:$0xf0] }
   0xd   :  { %v299_v2 = vld [vmem:[#allocation5 + $0x74] sm:$0xf]  ;;  %v279_v3 = vor.u32 %v300_v1, %v278_v0  ;;  %v280_v4 = vld [vmem:[#allocation5 + $0x78] sm:$0xf0]  ;;  %v270_v5 = vld [vmem:[#allocation5 + $0x60] sm:$0xf] }
   0xe   :  { %v298_v6 = vld [vmem:[#allocation5 + $0x64] sm:$0xf0]  ;;  %v283_v7 = vor.u32 %v299_v2, %v280_v4  ;;  %v297_v8 = vld [vmem:[#allocation5 + $0x64] sm:$0xf]  ;;  %v272_v9 = vld [vmem:[#allocation5 + $0x68] sm:$0xf0] }
   0xf   :  { %160 = vmatpush.bf16.msra.mxu0 %v279_v3  ;;  %v271_v10 = vor.u32 %v298_v6, %v270_v5  ;;  %v275_v11 = vor.u32 %v297_v8, %v272_v9  ;;  %v262_v12 = vld [vmem:[#allocation5 + $0x50] sm:$0xf]  ;;  %v296_v13 = vld [vmem:[#allocation5 + $0x54] sm:$0xf0]  ;;  %v295_v14 = vld [vmem:[#allocation5 + $0x54] sm:$0xf] }
  0x10   :  { %174 = vmatpush.bf16.msra.mxu1 %v283_v7  ;;  %v264_v15 = vld [vmem:[#allocation5 + $0x58] sm:$0xf0]  ;;  %v263_v16 = vor.u32 %v296_v13, %v262_v12  ;;  %v254_v18 = vld [vmem:[#allocation5 + $0x40] sm:$0xf]  ;;  %v294_v19 = vld [vmem:[#allocation5 + $0x44] sm:$0xf0] }
  0x11   :  { %v267_v17 = vor.u32 %v295_v14, %v264_v15  ;;  %v293_v20 = vld [vmem:[#allocation5 + $0x44] sm:$0xf]  ;;  %v256_v21 = vld [vmem:[#allocation5 + $0x48] sm:$0xf0]  ;;  %v255_v22 = vor.u32 %v294_v19, %v254_v18  ;;  %v246_v24 = vld [vmem:[#allocation5 + $0x30] sm:$0xf] }
  0x12   :  { %v259_v23 = vor.u32 %v293_v20, %v256_v21  ;;  %v292_v25 = vld [vmem:[#allocation5 + $0x34] sm:$0xf0]  ;;  %v291_v26 = vld [vmem:[#allocation5 + $0x34] sm:$0xf]  ;;  %v248_v27 = vld [vmem:[#allocation5 + $0x38] sm:$0xf0] }
  0x13   :  { %161 = vmatpush.bf16.msra.mxu0 %v271_v10  ;;  %v247_v28 = vor.u32 %v292_v25, %v246_v24  ;;  %v251_v29 = vor.u32 %v291_v26, %v248_v27  ;;  %v238_v30 = vld [vmem:[#allocation5 + $0x20] sm:$0xf]  ;;  %v290_v31 = vld [vmem:[#allocation5 + $0x24] sm:$0xf0]  ;;  %v289_v32 = vld [vmem:[#allocation5 + $0x24] sm:$0xf] }
  0x14   :  { %175 = vmatpush.bf16.msra.mxu1 %v275_v11  ;;  %v240_v33 = vld [vmem:[#allocation5 + $0x28] sm:$0xf0]  ;;  %v239_v34 = vor.u32 %v290_v31, %v238_v30  ;;  %v230_v36 = vld [vmem:[#allocation5 + $0x10] sm:$0xf]  ;;  %v288_v37 = vld [vmem:[#allocation5 + $0x14] sm:$0xf0] }
  0x15   :  { %v243_v35 = vor.u32 %v289_v32, %v240_v33  ;;  %v287_v38 = vld [vmem:[#allocation5 + $0x14] sm:$0xf]  ;;  %v232_v39 = vld [vmem:[#allocation5 + $0x18] sm:$0xf0]  ;;  %v231_v40 = vor.u32 %v288_v37, %v230_v36  ;;  %v222_v42 = vld [vmem:[#allocation5] sm:$0xf] }
  0x16   :  { %v235_v41 = vor.u32 %v287_v38, %v232_v39  ;;  %v286_v43 = vld [vmem:[#allocation5 + $0x4] sm:$0xf0]  ;;  %v285_v44 = vld [vmem:[#allocation5 + $0x4] sm:$0xf]  ;;  %v224_v45 = vld [vmem:[#allocation5 + $0x8] sm:$0xf0] }
  0x17   :  { %162 = vmatpush.bf16.msra.mxu0 %v263_v16  ;;  %v223_v46 = vor.u32 %v286_v43, %v222_v42  ;;  %v227_v47 = vor.u32 %v285_v44, %v224_v45  ;;  %v284_v48 = vld [vmem:[#allocation2] sm:$0xff]  ;;  %s395_s0 = smov [#allocation7]   ;;  %s202_s25 = sshll.u32 %s424_s2, 4  ;;  %s203_s25 = int_to_ptr.hbm [resolvable:$true] %s202_s25 }
  0x18   :  { %176 = vmatpush.bf16.msra.mxu1 %v267_v17  ;;  %s200_s1 = sshll.u32 %s395_s0, 4  ;;  %s396_s26 = smov 256   ;;  %s201_s1 = int_to_ptr.vmem [resolvable:$true] %s200_s1 }
  0x19   :  { %s397_s27 = smov 16  }
  0x1b   :  { %163 = vmatpush.bf16.msra.mxu0 %v255_v22 }
  0x1c   :  { %177 = vmatpush.bf16.msra.mxu1 %v259_v23 }
  0x1f   :  { %164 = vmatpush.bf16.msra.mxu0 %v247_v28 }
  0x20   :  { %178 = vmatpush.bf16.msra.mxu1 %v251_v29 }
  0x23   :  { %165 = vmatpush.bf16.msra.mxu0 %v239_v34 }
  0x24   :  { %179 = vmatpush.bf16.msra.mxu1 %v243_v35 }
  0x27   :  { %166 = vmatpush.bf16.msra.mxu0 %v231_v40 }
  0x28   :  { %180 = vmatpush.bf16.msra.mxu1 %v235_v41 }
  0x2b   :  { %167 = vmatpush.bf16.msra.mxu0 %v223_v46 }
  0x2c   :  { %181 = vmatpush.bf16.msra.mxu1 %v227_v47 }
  0x2e   :  { %168 = vmatmul.bf16.vlgmr.msra.gmra.mxu0 %v284_v48 }
  0x2f   :  { %182 = vmatmul.bf16.vlgmr.msra.gmra.mxu1 %v284_v48 }
  0xab   :  { %v169_v49 = vpop.f32.mrf.mxu0 }
  0xac   :  { %v183_v50 = vpop.f32.mrf.mxu1  ;;  %192 = vst [vmem:[#allocation7] sm:$0xff] %v169_v49 }
  0xad   :  { %193 = vst [vmem:[#allocation7 + $0x8] sm:$0xff] %v183_v50 }
  0xb3   :  { %v171_v51 = vpop.f32.mrf.mxu0 }
  0xb4   :  { %v185_v52 = vpop.f32.mrf.mxu1  ;;  %194 = vst [vmem:[#allocation7 + $0x10] sm:$0xff] %v171_v51 }
  0xb5   :  { %195 = vst [vmem:[#allocation7 + $0x18] sm:$0xff] %v185_v52 }
  0xb6   :  { %208 = dma.vmem_to_hbm [thread:$0]  %s201_s1, 512, %s203_s25, [#allocation4], %s396_s26, %s396_s26, %s397_s27  }
  0xb7   :  { %387 = dma.done.wait [#allocation4], 512  }
  0xb8   :  { %388 = vsyncadd [#allocation4], 4294966784 }
  0xb9   :  { %213 = vsyncpa [#allocation3], 1 }
  0xba   :  { %214 = vsyncpa [#allocation6], 1 }
  0xbb   :  { %215 = vsyncpa [#allocation4], 1 }

</bundles_post_ra>
